<compile_context>
chip_gen: v7x
topology: tpu7x:2x2x1
jax: 0.10.0
libtpu: 0.0.40
codegen_flags: <defaults>
</compile_context>

<pallas_src>
import jax
import jax.numpy as jnp
from jax.experimental import pallas as pl
from jax.experimental.pallas import tpu as pltpu


def _round_up(x, m):
    return ((x + m - 1) // m) * m


def _vpu_outer_mac(wT, hT):
    """(N,K) x (K,Tm) via outer-product MAC on the VPU, lane-dense in Tm.

    wT[:, k:k+1] is an (N,1) lane-broadcast weight column, hT[k:k+1, :] is a
    (1,Tm) sublane-broadcast activation row.  K,N <= 16 -> fully unrolled.
    """
    K = hT.shape[0]
    acc = wT[:, 0:1] * hT[0:1, :]
    for k in range(1, K):
        acc = acc + wT[:, k:k + 1] * hT[k:k + 1, :]
    return acc


# ---------------------------------------------------------------------------
# Fused full-model kernel (weights resident, intermediates never touch HBM)
# ---------------------------------------------------------------------------
def fused_mlp_kernel(xT_ref, w_ref, b_ref, o_ref):
    xT = xT_ref[...]          # (3, Tm)   batch on lanes
    w = w_ref[...]            # (32, 16)  packed transposed weights
    b = b_ref[...]            # (16, 4)   packed biases, one column per layer

    # MyDenseLayer(3, 16) + ReLU
    h = jnp.maximum(_vpu_outer_mac(w[0:16, 0:3], xT) + b[0:16, 0:1], 0.0)
    # Linear(16, 8) + ReLU
    h = jnp.maximum(_vpu_outer_mac(w[16:24, 0:16], h) + b[0:8, 1:2], 0.0)
    # Linear(8, 4) + ReLU
    h = jnp.maximum(_vpu_outer_mac(w[24:28, 0:8], h) + b[0:4, 2:3], 0.0)
    # Linear(4, 1) + Sigmoid (exp + approx reciprocal on the EUP slot)
    z = _vpu_outer_mac(w[28:29, 0:4], h) + b[0:1, 3:4]          # (1, Tm)
    o_ref[...] = pl.reciprocal(1.0 + jnp.exp(-z), approx=True).astype(o_ref.dtype)


def pack_params(p):
    """Pack transposed weights + biases into two small slabs.  Call ONCE."""
    w_slab = jnp.zeros((32, 16), jnp.float32)
    w_slab = w_slab.at[0:16, 0:3].set(p["W0"].T)     # (16, 3)
    w_slab = w_slab.at[16:24, 0:16].set(p["W1"].T)   # (8, 16)
    w_slab = w_slab.at[24:28, 0:8].set(p["W2"].T)    # (4, 8)
    w_slab = w_slab.at[28:29, 0:4].set(p["W3"].T)    # (1, 4)

    b_slab = jnp.zeros((16, 4), jnp.float32)
    b_slab = b_slab.at[0:16, 0].set(p["b0"][0])
    b_slab = b_slab.at[0:8, 1].set(p["b1"][0])
    b_slab = b_slab.at[0:4, 2].set(p["b2"][0])
    b_slab = b_slab.at[0:1, 3].set(p["b3"][0])
    return w_slab, b_slab


def model_forward(x, packed, *, tm=16384):
    """Forward pass of the whole nn.Sequential as one pallas_call.

    x: (M, 3) float32.  Returns (M, 1) float32.
    Batch is zero-padded to a multiple of tile_m and tiled over a "parallel"
    grid axis (megacore sharding on v7x); padded lanes are sliced off.
    """
    w_slab, b_slab = packed
    M, K = x.shape
    assert K == 3

    tm = max(128, _round_up(tm, 128))
    tile_m = min(tm, _round_up(M, 128))        # lane-aligned tile
    Mp = _round_up(M, tile_m)

    xT = x.T                                    # (3, M): lane-dense input DMA
    if Mp != M:
        xT = jnp.pad(xT, ((0, 0), (0, Mp - M)))  # zero lanes -> harmless compute

    out = pl.pallas_call(
        fused_mlp_kernel,
        out_shape=jax.ShapeDtypeStruct((1, Mp), jnp.float32),
        grid=(Mp // tile_m,),
        in_specs=[
            pl.BlockSpec((3, tile_m), lambda i: (0, i)),    # x^T, tiled over batch
            pl.BlockSpec((32, 16), lambda i: (0, 0)),       # weight slab, resident
            pl.BlockSpec((16, 4), lambda i: (0, 0)),        # bias slab, resident
        ],
        out_specs=pl.BlockSpec((1, tile_m), lambda i: (0, i)),  # lane-dense store
        compiler_params=pltpu.CompilerParams(
            dimension_semantics=("parallel",)),
    )(xT, w_slab, b_slab)

    return out[0, :M].reshape(M, 1)             # same linear order -> free


# ---------------------------------------------------------------------------
# Standalone MyDenseLayer kernel (the requested module on its own)
# ---------------------------------------------------------------------------
def dense_relu_kernel(xT_ref, wT_ref, bT_ref, o_ref):
    z = _vpu_outer_mac(wT_ref[...], xT_ref[...]) + bT_ref[...]
    o_ref[...] = jnp.maximum(z, 0.0).astype(o_ref.dtype)


def my_dense_layer(x, W, b, *, tm=16384):
    """MyDenseLayer.forward: relu(x @ W + b), lane-dense transposed layout."""
    M, K = x.shape
    K2, N = W.shape
    assert K == K2 and b.shape == (1, N)

    tm = max(128, _round_up(tm, 128))
    tile_m = min(tm, _round_up(M, 128))
    Mp = _round_up(M, tile_m)

    xT = x.T
    if Mp != M:
        xT = jnp.pad(xT, ((0, 0), (0, Mp - M)))

    out_t = pl.pallas_call(
        dense_relu_kernel,
        out_shape=jax.ShapeDtypeStruct((N, Mp), jnp.float32),
        grid=(Mp // tile_m,),
        in_specs=[
            pl.BlockSpec((K, tile_m), lambda i: (0, i)),
            pl.BlockSpec((N, K), lambda i: (0, 0)),
            pl.BlockSpec((N, 1), lambda i: (0, 0)),
        ],
        out_specs=pl.BlockSpec((N, tile_m), lambda i: (0, i)),
        compiler_params=pltpu.CompilerParams(
            dimension_semantics=("parallel",)),
    )(xT, W.T, b.T)

    return out_t[:, :M].T


# ---------------------------------------------------------------------------
# Params / reference
# ---------------------------------------------------------------------------
def init_params(key):
    """Deterministic parameter init mirroring the PyTorch module shapes."""
    keys = jax.random.split(key, 8)
    params = {}
    # MyDenseLayer(3, 16): W ~ randn, b ~ randn
    params["W0"] = jax.random.normal(keys[0], (3, 16), jnp.float32)
    params["b0"] = jax.random.normal(keys[1], (1, 16), jnp.float32)
    # nn.Linear(16, 8)
    params["W1"] = jax.random.normal(keys[2], (16, 8), jnp.float32) * 0.1
    params["b1"] = jax.random.normal(keys[3], (1, 8), jnp.float32) * 0.1
    # nn.Linear(8, 4)
    params["W2"] = jax.random.normal(keys[4], (8, 4), jnp.float32) * 0.1
    params["b2"] = jax.random.normal(keys[5], (1, 4), jnp.float32) * 0.1
    # nn.Linear(4, 1)
    params["W3"] = jax.random.normal(keys[6], (4, 1), jnp.float32) * 0.1
    params["b3"] = jax.random.normal(keys[7], (1, 1), jnp.float32) * 0.1
    return params


def _model_ref(x, p):
    """Plain-JAX reference of the full sequential model."""
    h = jnp.maximum(x @ p["W0"] + p["b0"], 0.0)
    h = jnp.maximum(h @ p["W1"] + p["b1"], 0.0)
    h = jnp.maximum(h @ p["W2"] + p["b2"], 0.0)
    return jax.nn.sigmoid(h @ p["W3"] + p["b3"])


if __name__ == "__main__":
    key = jax.random.PRNGKey(0)
    params = init_params(key)
    packed = pack_params(params)   # packed once, outside the per-call path

    # Small deterministic batch (batch=2, input_dim=3) + the exact student_data row.
    x_rand = jax.random.normal(jax.random.fold_in(key, 123), (2, 3), jnp.float32)
    student_data = jnp.array([[8.0, 6.0, 4.0]], dtype=jnp.float32)

    # MyDenseLayer on its own (the requested module).
    y_layer = jax.block_until_ready(
        my_dense_layer(x_rand, params["W0"], params["b0"]))
    ref_layer = jnp.maximum(x_rand @ params["W0"] + params["b0"], 0.0)
    assert y_layer.shape == (2, 16)
    assert jnp.allclose(y_layer, ref_layer, atol=1e-5, rtol=1e-5)

    # Full sequential model (single fused Pallas kernel), as in the reference script.
    y_model = jax.block_until_ready(model_forward(student_data, packed))
    ref_model = _model_ref(student_data, params)
    assert y_model.shape == (1, 1)
    assert jnp.allclose(y_model, ref_model, atol=1e-3, rtol=1e-3)

    # Multi-step "parallel" grid path (small tm forces several lane-dense tiles).
    x_big = jax.random.normal(jax.random.fold_in(key, 7), (1024, 3), jnp.float32)
    y_big = jax.block_until_ready(model_forward(x_big, packed, tm=256))
    ref_big = _model_ref(x_big, params)
    assert y_big.shape == (1024, 1)
    assert jnp.allclose(y_big, ref_big, atol=1e-3, rtol=1e-3)

    # Ragged batch: exercises zero-padded cdiv tiling + final slice.
    x_rag = jax.random.normal(jax.random.fold_in(key, 11), (1000, 3), jnp.float32)
    y_rag = jax.block_until_ready(model_forward(x_rag, packed, tm=256))
    ref_rag = _model_ref(x_rag, params)
    assert y_rag.shape == (1000, 1)
    assert jnp.allclose(y_rag, ref_rag, atol=1e-3, rtol=1e-3)

    print("KERNEL_OK")
</pallas_src>

<mosaic_0001>
module attributes {stable_mosaic.version = 11 : i64} {
  func.func @dense_relu_kernel(%arg0: i32, %arg1: memref<3x128xf32, #tpu.memory_space<vmem>>, %arg2: memref<16x3xf32, #tpu.memory_space<vmem>>, %arg3: memref<16x1xf32, #tpu.memory_space<vmem>>, %arg4: memref<16x128xf32, #tpu.memory_space<vmem>>) attributes {dimension_semantics = [#tpu.dimension_semantics<parallel>], iteration_bounds = array<i64: 1>, scalar_prefetch = 0 : i64, scratch_operands = 0 : i64, tpu.core_type = #tpu.core_type<tc>, window_params = [{transform_indices = @transform_0, window_bounds = array<i64: 3, 128>}, {pipeline_mode = #tpu.pipeline_mode<synchronous>, transform_indices = @transform_1, window_bounds = array<i64: 16, 3>}, {pipeline_mode = #tpu.pipeline_mode<synchronous>, transform_indices = @transform_2, window_bounds = array<i64: 16, 1>}, {transform_indices = @transform_3, window_bounds = array<i64: 16, 128>}]} {
    %c0 = arith.constant 0 : index
    %c0_0 = arith.constant 0 : index
    %0 = vector.load %arg2[%c0, %c0_0] : memref<16x3xf32, #tpu.memory_space<vmem>>, vector<16x3xf32>
    %c0_1 = arith.constant 0 : index
    %c0_2 = arith.constant 0 : index
    %1 = vector.load %arg1[%c0_1, %c0_2] : memref<3x128xf32, #tpu.memory_space<vmem>>, vector<3x128xf32>
    %2 = vector.extract_strided_slice %0 {offsets = [0, 0], sizes = [16, 1], strides = [1, 1]} : vector<16x3xf32> to vector<16x1xf32>
    %3 = vector.extract_strided_slice %1 {offsets = [0, 0], sizes = [1, 128], strides = [1, 1]} : vector<3x128xf32> to vector<1x128xf32>
    %4 = vector.broadcast %2 : vector<16x1xf32> to vector<16x128xf32>
    %5 = vector.broadcast %3 : vector<1x128xf32> to vector<16x128xf32>
    %6 = arith.mulf %4, %5 : vector<16x128xf32>
    %7 = vector.extract_strided_slice %0 {offsets = [0, 1], sizes = [16, 1], strides = [1, 1]} : vector<16x3xf32> to vector<16x1xf32>
    %8 = vector.extract_strided_slice %1 {offsets = [1, 0], sizes = [1, 128], strides = [1, 1]} : vector<3x128xf32> to vector<1x128xf32>
    %9 = vector.broadcast %7 : vector<16x1xf32> to vector<16x128xf32>
    %10 = vector.broadcast %8 : vector<1x128xf32> to vector<16x128xf32>
    %11 = arith.mulf %9, %10 : vector<16x128xf32>
    %12 = arith.addf %6, %11 : vector<16x128xf32>
    %13 = vector.extract_strided_slice %0 {offsets = [0, 2], sizes = [16, 1], strides = [1, 1]} : vector<16x3xf32> to vector<16x1xf32>
    %14 = vector.extract_strided_slice %1 {offsets = [2, 0], sizes = [1, 128], strides = [1, 1]} : vector<3x128xf32> to vector<1x128xf32>
    %15 = vector.broadcast %13 : vector<16x1xf32> to vector<16x128xf32>
    %16 = vector.broadcast %14 : vector<1x128xf32> to vector<16x128xf32>
    %17 = arith.mulf %15, %16 : vector<16x128xf32>
    %18 = arith.addf %12, %17 : vector<16x128xf32>
    %c0_3 = arith.constant 0 : index
    %c0_4 = arith.constant 0 : index
    %19 = vector.load %arg3[%c0_3, %c0_4] : memref<16x1xf32, #tpu.memory_space<vmem>>, vector<16x1xf32>
    %20 = vector.broadcast %19 : vector<16x1xf32> to vector<16x128xf32>
    %21 = arith.addf %18, %20 : vector<16x128xf32>
    %cst = arith.constant 0.000000e+00 : f32
    %22 = vector.broadcast %cst : f32 to vector<16x128xf32>
    %23 = arith.maximumf %21, %22 : vector<16x128xf32>
    %c0_5 = arith.constant 0 : index
    %c0_6 = arith.constant 0 : index
    %24 = vector.load %arg4[%c0_5, %c0_6] : memref<16x128xf32, #tpu.memory_space<vmem>>, vector<16x128xf32>
    tpu.vector_store %arg4[%c0_5, %c0_6], %23 {strides = array<i32>} : memref<16x128xf32, #tpu.memory_space<vmem>>, vector<16x128xf32>,
    return
  }
  func.func @transform_0(%arg0: i32) -> (i32, i32) {
    %c0_i32 = arith.constant 0 : i32
    %c0_i32_0 = arith.constant 0 : i32
    return %c0_i32, %arg0 : i32, i32
  }
  func.func @transform_1(%arg0: i32) -> (i32, i32) {
    %c0_i32 = arith.constant 0 : i32
    %c0_i32_0 = arith.constant 0 : i32
    %c0_i32_1 = arith.constant 0 : i32
    return %c0_i32, %c0_i32_0 : i32, i32
  }
  func.func @transform_2(%arg0: i32) -> (i32, i32) {
    %c0_i32 = arith.constant 0 : i32
    %c0_i32_0 = arith.constant 0 : i32
    %c0_i32_1 = arith.constant 0 : i32
    return %c0_i32, %c0_i32_0 : i32, i32
  }
  func.func @transform_3(%arg0: i32) -> (i32, i32) {
    %c0_i32 = arith.constant 0 : i32
    %c0_i32_0 = arith.constant 0 : i32
    return %c0_i32, %arg0 : i32, i32
  }
}

</mosaic_0001>

<bundles_post_ra>
// kernel: tpu_custom_call.1
= control target key start
LH: loop header
LB: loop body
LE: loop exit
PB: predicated region body
PF: predicated region fallthrough
CT: control target
= control target key end

     0   :  { %v136_v1 = vmov 1   ;;  %v137_v2 = vmov 0   ;;  %s189_s0 = inlined_call_operand.vmem [shape: f32[3,128], index: 0, kind: input, shape index: {}]   ;;  %s190_s1 = inlined_call_operand.vmem [shape: f32[16,3], index: 1, kind: input, shape index: {}]   ;;  %s191_s2 = inlined_call_operand.vmem [shape: f32[16,1], index: 2, kind: input, shape index: {}]   ;;  %s192_s3 = inlined_call_operand.hbm [shape: f32[16,128], index: 3, kind: output, shape index: {}]  }
   0x1   :  { %v15_v0 = vld [vmem:[%s190_s1] sm:$0xff]  ;;  %107 = vset.pattern.permute.xlu1 %v136_v1  ;;  %106 = vset.pattern.permute.xlu0 %v137_v2 }
   0x2   :  { %8 = vsyncpa [#allocation3], 0  ;;  %35 = vperm.xlu1 %107, %v15_v0   ;;  %20 = vperm.xlu0 %106, %v15_v0   ;;  %v16_v3 = vld [vmem:[%s190_s1 + $0x8] sm:$0xff]  ;;  %v138_v4 = vmov 2   ;;  %v66_v5 = vld [vmem:[%s191_s2] sm:$0xff]  ;;  %v28_v7 = vlaneseq }
   0x3   :  { %v67_v6 = vld [vmem:[%s191_s2 + $0x8] sm:$0xff]  ;;  %v17_v11 = vld [vmem:[%s189_s0] sm:$0x7]  ;;  %s139_s0 = smov [#allocation2]  }
   0x4   :  { %v29_v8 = vshrl.u32 %v28_v7, 7  ;;  %s89_s2 = sshll.u32 %s139_s0, 4  ;;  %s90_s2 = int_to_ptr.vmem [resolvable:$true] %s89_s2 }
   0x5   :  { %s112_s21 = scalar_lea.vmem %s90_s2, 256  ;;  %p117_p1 = scmp.lt.s32.totalorder %s90_s2, %s90_s2 }
   0x6   :  { %39 = vperm.xlu1 %107, %v16_v3   ;;  %25 = vperm.xlu0 %106, %v16_v3   ;;  %v44_v9 = vsub.s32 1, %v29_v8  ;;  %v30_v10 = vsub.s32 0, %v29_v8  ;;  %v60_v14 = vsub.s32 2, %v29_v8  ;;  %p113_p0 = scmp.ne.s32.totalorder %s90_s2, %s112_s21  ;;  %p118_p2 = scmp.lt.s32.totalorder %s112_s21, %s112_s21 }
   0x8   :  { %v45_v15 = vrot.slane %v17_v11, %v44_v9  ;;  %v31_v16 = vrot.slane %v17_v11, %v30_v10  ;;  %v61_v19 = vrot.slane %v17_v11, %v60_v14  ;;  %p119_p3 = por %p118_p2, %p117_p1 }
   0xa   :  { %109 = vset.pattern.permute.xlu1 %v138_v4  ;;  %108 = vset.pattern.permute.xlu0 %v138_v4  ;;  %p120_p4 = pnand %p119_p3, %p113_p0 }
   0xb   :  { %55 = vperm.xlu1 %109, %v16_v3   ;;  %51 = vperm.xlu0 %108, %v15_v0  }
   0xf   :  { %110 = vset.pattern.permute.xlu1 %v137_v2  ;;  %111 = vset.pattern.permute.xlu0 %v137_v2 }
  0x10   :  { %70 = vperm.xlu1 %110, %v66_v5   ;;  %75 = vperm.xlu0 %111, %v67_v6  }
  0x81   :  { %v36_v12 = vpop.permute.xlu1 %35  ;;  %v21_v13 = vpop.permute.xlu0 %20 }
  0x82   :  { %v46_v20 = vmul.f32 %v45_v15, %v36_v12  ;;  %v32_v21 = vmul.f32 %v31_v16, %v21_v13 }
  0x84   :  { %v48_v26 = vadd.f32 %v46_v20, %v32_v21 }
  0x85   :  { %v40_v17 = vpop.permute.xlu1 %39  ;;  %v26_v18 = vpop.permute.xlu0 %25 }
  0x86   :  { %v47_v22 = vmul.f32 %v45_v15, %v40_v17  ;;  %v33_v23 = vmul.f32 %v31_v16, %v26_v18 }
  0x88   :  { %v49_v27 = vadd.f32 %v47_v22, %v33_v23 }
  0x8a   :  { %v56_v24 = vpop.permute.xlu1 %55  ;;  %v52_v25 = vpop.permute.xlu0 %51 }
  0x8b   :  { %v63_v28 = vmul.f32 %v61_v19, %v56_v24  ;;  %v62_v29 = vmul.f32 %v61_v19, %v52_v25 }
  0x8d   :  { %v64_v30 = vadd.f32 %v62_v29, %v48_v26  ;;  %v65_v31 = vadd.f32 %v63_v28, %v49_v27 }
  0x8f   :  { %v71_v32 = vpop.permute.xlu1 %70  ;;  %v76_v33 = vpop.permute.xlu0 %75 }
  0x90   :  { %v78_v34 = vadd.f32 %v71_v32, %v64_v30  ;;  %v79_v35 = vadd.f32 %v76_v33, %v65_v31 }
  0x92   :  { %v80_v36 = vmax.f32 %v78_v34, 0.0  ;;  %v81_v37 = vmax.f32 %v79_v35, 0.0 }
  0x94   :  { %82 = vst [vmem:[#allocation2] sm:$0xff] %v80_v36  ;;  %83 = vst [vmem:[#allocation2 + $0x8] sm:$0xff] %v81_v37 }
  0x95   :  { %123 = shalt.err (!%p120_p4)
}
  0x96   :  { %s124_s24 = scalar_lea.hbm %s192_s3, 256 }
  0x97   :  { %p125_p5 = scmp.ne.s32.totalorder %s192_s3, %s124_s24  ;;  %p128_p6 = scmp.lt.u32.totalorder %s124_s24, %s192_s3 }
  0x99   :  { %p130_p7 = pnand %p128_p6, %p125_p5 }
  0x9b   :  { %133 = shalt.err (!%p130_p7)
}
  0x9c   :  { %s140_s29 = smov 128   ;;  %s141_s30 = smov 8  }
  0x9d   :  { %95 = dma.vmem_to_hbm [thread:$0]  %s90_s2, 256, %s192_s3, [#allocation3], %s140_s29, %s140_s29, %s141_s30  }
  0x9e   :  { %134 = dma.done.wait [#allocation3], 256  }
  0x9f   :  { %135 = vsyncadd [#allocation3], 4294967040 }
  0xa0   :  { %99 = vsyncpa [#allocation3], 1 }

</bundles_post_ra>
